<compile_context>
chip_gen: v7x
topology: tpu7x:2x2x1
jax: 0.10.0
libtpu: 0.0.40
codegen_flags: <defaults>
</compile_context>

<pallas_src>
import functools

import jax
import jax.numpy as jnp
from jax.experimental import pallas as pl
from jax.experimental.pallas import tpu as pltpu

LANE = 128        # output lanes padded to a multiple of this
DEFAULT_TK = 512  # K-tile: (512, 128) f32 weight tile = 256 KiB, double-buffered


def _linear_sigmoid_kernel(x_ref, wt_ref, b_ref, o_ref, acc_ref):
    """Accumulate x-tile @ W-tile over the K grid axis; finalize with sigmoid.

    x_ref : (1, tk)      f32   slice of the flattened input row vector
    wt_ref: (tk, Npad)   f32   slice of the pre-transposed, lane-padded weight
    b_ref : (1, Npad)    f32   lane-padded bias (same block every step)
    o_ref : (1, Npad)    f32   sigmoid output (written on the last step)
    acc_ref: (1, Npad)   f32   VMEM accumulator scratch
    """
    k = pl.program_id(0)

    @pl.when(k == 0)
    def _():
        acc_ref[...] = jnp.zeros_like(acc_ref)

    acc_ref[...] += jnp.dot(
        x_ref[...], wt_ref[...], preferred_element_type=jnp.float32
    )

    @pl.when(k == pl.num_programs(0) - 1)
    def _():
        z = acc_ref[...] + b_ref[...]
        # sigmoid(z) = 1 / (1 + exp(-z)); exp and approx-reciprocal both run
        # on the EUP slot, keeping the VPU free.
        o_ref[...] = pl.reciprocal(1.0 + jnp.exp(-z), approx=True)


def pack_params(weight, bias, tk=DEFAULT_TK):
    """One-time repack of nn.Linear params into the kernel's layout.

    weight: (num_classes, input_size) -> (K_pad, N_pad) f32, transposed and
            zero-padded so K_pad % tk == 0 and N_pad % 128 == 0.
    bias  : (num_classes,)            -> (1, N_pad) f32 zero-padded.
    """
    num_classes, input_size = weight.shape
    n_pad = pl.cdiv(num_classes, LANE) * LANE
    k_pad = pl.cdiv(input_size, tk) * tk

    wt = jnp.zeros((k_pad, n_pad), jnp.float32)
    wt = wt.at[:input_size, :num_classes].set(weight.T.astype(jnp.float32))
    bp = jnp.zeros((1, n_pad), jnp.float32)
    bp = bp.at[0, :num_classes].set(bias.astype(jnp.float32))
    return wt, bp


@functools.partial(jax.jit, static_argnames=("num_classes", "tk"))
def nn_forward(x, wt_packed, b_packed, *, num_classes, tk=DEFAULT_TK):
    """Pallas equivalent of NN.forward, fused into one jitted dispatch.

    x        : any-shaped tensor; total element count == input_size
    wt_packed: (K_pad, N_pad) f32   from pack_params
    b_packed : (1, N_pad)     f32   from pack_params
    returns  : (num_classes,) f32
    """
    k_pad, n_pad = wt_packed.shape

    # torch: x.float().view(-1)  -> (1, K) row vector, zero-padded to K_pad
    # (zero input rows hit zero weight rows, so the result is unchanged).
    x_flat = x.astype(jnp.float32).reshape(1, -1)
    input_size = x_flat.shape[1]
    if input_size < k_pad:
        x_flat = jnp.pad(x_flat, ((0, 0), (0, k_pad - input_size)))

    grid_k = k_pad // tk

    out_padded = pl.pallas_call(
        _linear_sigmoid_kernel,
        out_shape=jax.ShapeDtypeStruct((1, n_pad), jnp.float32),
        grid_spec=pltpu.PrefetchScalarGridSpec(
            num_scalar_prefetch=0,
            grid=(grid_k,),
            in_specs=[
                pl.BlockSpec((1, tk), lambda k: (0, k)),
                pl.BlockSpec((tk, n_pad), lambda k: (k, 0)),
                pl.BlockSpec((1, n_pad), lambda k: (0, 0)),
            ],
            out_specs=pl.BlockSpec((1, n_pad), lambda k: (0, 0)),
            scratch_shapes=[pltpu.VMEM((1, n_pad), jnp.float32)],
        ),
        compiler_params=pltpu.CompilerParams(
            dimension_semantics=("arbitrary",),  # K is a reduction axis
        ),
        cost_estimate=pl.CostEstimate(
            flops=2 * k_pad * n_pad,
            transcendentals=n_pad,
            bytes_accessed=4 * (k_pad * n_pad + k_pad + 2 * n_pad),
        ),
    )(x_flat, wt_packed, b_packed)

    return out_padded[0, :num_classes]


def _init_linear_params(key, in_features, out_features):
    """Deterministic init mirroring nn.Linear's default U(-1/sqrt(fan_in), +1/sqrt(fan_in))."""
    k_w, k_b = jax.random.split(key)
    bound = 1.0 / jnp.sqrt(jnp.float32(in_features))
    w = jax.random.uniform(k_w, (out_features, in_features), jnp.float32, -bound, bound)
    b = jax.random.uniform(k_b, (out_features,), jnp.float32, -bound, bound)
    return w, b


if __name__ == "__main__":
    key = jax.random.PRNGKey(0)
    k_x, k_p = jax.random.split(key)

    # Small shapes consistent with the module: forward flattens everything,
    # so input_size must equal the total element count of x.
    x_shape = (2, 4, 16, 16)          # NCHW-style input
    input_size = 2 * 4 * 16 * 16      # = 2048
    num_classes = 10

    x = jax.random.normal(k_x, x_shape, dtype=jnp.float32)
    weight, bias = _init_linear_params(k_p, input_size, num_classes)

    # One-time parameter repack (hoisted out of the forward path).
    wt_packed, b_packed = pack_params(weight, bias)

    out = nn_forward(x, wt_packed, b_packed, num_classes=num_classes)
    out = jax.block_until_ready(out)

    # Sanity check against a plain-JAX reference of the same math.
    # Tolerance is loosened slightly because the kernel uses the EUP
    # approximate reciprocal for the sigmoid denominator.
    ref = jax.nn.sigmoid(weight @ x.reshape(-1) + bias)
    assert out.shape == (num_classes,)
    assert jnp.allclose(out, ref, atol=2e-3, rtol=2e-3), float(jnp.max(jnp.abs(out - ref)))

    print("KERNEL_OK")
</pallas_src>

<mosaic_0001>
module attributes {stable_mosaic.version = 11 : i64} {
  func.func @_linear_sigmoid_kernel(%arg0: i32, %arg1: memref<1x512xf32, #tpu.memory_space<vmem>>, %arg2: memref<512x128xf32, #tpu.memory_space<vmem>>, %arg3: memref<1x128xf32, #tpu.memory_space<vmem>>, %arg4: memref<1x128xf32, #tpu.memory_space<vmem>>, %arg5: memref<1x128xf32, #tpu.memory_space<vmem>>) attributes {dimension_semantics = [#tpu.dimension_semantics<arbitrary>], iteration_bounds = array<i64: 4>, scalar_prefetch = 0 : i64, scratch_operands = 1 : i64, tpu.core_type = #tpu.core_type<tc>, window_params = [{transform_indices = @transform_0, window_bounds = array<i64: 1, 512>}, {transform_indices = @transform_1, window_bounds = array<i64: 512, 128>}, {pipeline_mode = #tpu.pipeline_mode<synchronous>, transform_indices = @transform_2, window_bounds = array<i64: 1, 128>}, {pipeline_mode = #tpu.pipeline_mode<synchronous>, transform_indices = @transform_3, window_bounds = array<i64: 1, 128>}]} {
    %c0_i32 = arith.constant 0 : i32
    %0 = arith.cmpi eq, %arg0, %c0_i32 : i32
    %1 = arith.extui %0 : i1 to i32
    %c0_i32_0 = arith.constant 0 : i32
    %2 = arith.cmpi ne, %1, %c0_i32_0 : i32
    scf.if %2 {
      %cst_9 = arith.constant 0.000000e+00 : f32
      %12 = vector.broadcast %cst_9 : f32 to vector<1x128xf32>
      %c0_10 = arith.constant 0 : index
      %c0_11 = arith.constant 0 : index
      %13 = vector.load %arg5[%c0_10, %c0_11] : memref<1x128xf32, #tpu.memory_space<vmem>>, vector<1x128xf32>
      tpu.vector_store %arg5[%c0_10, %c0_11], %12 {strides = array<i32>} : memref<1x128xf32, #tpu.memory_space<vmem>>, vector<1x128xf32>,
    } else {
    }
    %c0 = arith.constant 0 : index
    %c0_1 = arith.constant 0 : index
    %3 = vector.load %arg5[%c0, %c0_1] : memref<1x128xf32, #tpu.memory_space<vmem>>, vector<1x128xf32>
    %c0_2 = arith.constant 0 : index
    %c0_3 = arith.constant 0 : index
    %4 = vector.load %arg1[%c0_2, %c0_3] : memref<1x512xf32, #tpu.memory_space<vmem>>, vector<1x512xf32>
    %c0_4 = arith.constant 0 : index
    %c0_5 = arith.constant 0 : index
    %5 = vector.load %arg2[%c0_4, %c0_5] : memref<512x128xf32, #tpu.memory_space<vmem>>, vector<512x128xf32>
    %cst = arith.constant dense<0.000000e+00> : vector<1x128xf32>
    %6 = tpu.matmul %4, %5, %cst {dimension_numbers = #tpu.dot_dimension_numbers<[1], [0], [0], [1], [0, 0, 1, 1], [], []>} : vector<1x512xf32>, vector<512x128xf32>, vector<1x128xf32> -> vector<1x128xf32>
    %7 = arith.addf %3, %6 : vector<1x128xf32>
    %c0_6 = arith.constant 0 : index
    %c0_7 = arith.constant 0 : index
    %8 = vector.load %arg5[%c0_6, %c0_7] : memref<1x128xf32, #tpu.memory_space<vmem>>, vector<1x128xf32>
    tpu.vector_store %arg5[%c0_6, %c0_7], %7 {strides = array<i32>} : memref<1x128xf32, #tpu.memory_space<vmem>>, vector<1x128xf32>,
    %c3_i32 = arith.constant 3 : i32
    %9 = arith.cmpi eq, %arg0, %c3_i32 : i32
    %10 = arith.extui %9 : i1 to i32
    %c0_i32_8 = arith.constant 0 : i32
    %11 = arith.cmpi ne, %10, %c0_i32_8 : i32
    scf.if %11 {
      %c0_9 = arith.constant 0 : index
      %c0_10 = arith.constant 0 : index
      %12 = vector.load %arg5[%c0_9, %c0_10] : memref<1x128xf32, #tpu.memory_space<vmem>>, vector<1x128xf32>
      %c0_11 = arith.constant 0 : index
      %c0_12 = arith.constant 0 : index
      %13 = vector.load %arg3[%c0_11, %c0_12] : memref<1x128xf32, #tpu.memory_space<vmem>>, vector<1x128xf32>
      %14 = arith.addf %12, %13 : vector<1x128xf32>
      %cst_13 = arith.constant 0.000000e+00 : f32
      %15 = vector.broadcast %cst_13 : f32 to vector<1x128xf32>
      %16 = arith.subf %15, %14 : vector<1x128xf32>
      %17 = math.exp %16 : vector<1x128xf32>
      %cst_14 = arith.constant 1.000000e+00 : f32
      %18 = vector.broadcast %cst_14 : f32 to vector<1x128xf32>
      %19 = arith.addf %18, %17 : vector<1x128xf32>
      %20 = tpu.reciprocal %19 {approx = true} : vector<1x128xf32> -> vector<1x128xf32>
      %c0_15 = arith.constant 0 : index
      %c0_16 = arith.constant 0 : index
      %21 = vector.load %arg4[%c0_15, %c0_16] : memref<1x128xf32, #tpu.memory_space<vmem>>, vector<1x128xf32>
      tpu.vector_store %arg4[%c0_15, %c0_16], %20 {strides = array<i32>} : memref<1x128xf32, #tpu.memory_space<vmem>>, vector<1x128xf32>,
    } else {
    }
    return
  }
  func.func @transform_0(%arg0: i32) -> (i32, i32) {
    %c0_i32 = arith.constant 0 : i32
    %c0_i32_0 = arith.constant 0 : i32
    return %c0_i32, %arg0 : i32, i32
  }
  func.func @transform_1(%arg0: i32) -> (i32, i32) {
    %c0_i32 = arith.constant 0 : i32
    %c0_i32_0 = arith.constant 0 : i32
    return %arg0, %c0_i32 : i32, i32
  }
  func.func @transform_2(%arg0: i32) -> (i32, i32) {
    %c0_i32 = arith.constant 0 : i32
    %c0_i32_0 = arith.constant 0 : i32
    %c0_i32_1 = arith.constant 0 : i32
    return %c0_i32, %c0_i32_0 : i32, i32
  }
  func.func @transform_3(%arg0: i32) -> (i32, i32) {
    %c0_i32 = arith.constant 0 : i32
    %c0_i32_0 = arith.constant 0 : i32
    %c0_i32_1 = arith.constant 0 : i32
    return %c0_i32, %c0_i32_0 : i32, i32
  }
}

</mosaic_0001>

<bundles_post_ra>
// kernel: nn_forward.1
= control target key start
LH: loop header
LB: loop body
LE: loop exit
PB: predicated region body
PF: predicated region fallthrough
CT: control target
= control target key end

     0   :  { %8 = vsyncpa [#allocation4], 0  ;;  %s970_s0 = inlined_call_operand.vmem [shape: f32[1,2048], index: 0, kind: input, shape index: {}]   ;;  %s971_s1 = inlined_call_operand.hbm [shape: f32[2048,128], index: 1, kind: input, shape index: {}]   ;;  %s972_s2 = inlined_call_operand.vmem [shape: f32[1,128], index: 2, kind: input, shape index: {}]   ;;  %s973_s3 = inlined_call_operand.vmem [shape: f32[1,128], index: 3, kind: output, shape index: {}]  }
   0x1   :  { %10 = vsyncpa [#allocation4 + $0x1], 0  ;;  %s775_s12 = smov 0   ;;  %s777_s13 = smov 0  }
   0x2   :  { %s779_s14 = smov 0   ;;  %s781_s15 = smov 0  }
   0x3 LB: > { %s794_s16 = sadd.s32 4294967295, %s749_s15   ;;  %s797_s17 = sadd.s32 1, %s749_s15   ;;  %s749_s15 = sphi %s781_s15, %s980_s15   ;;  %s745_s14 = sphi %s779_s14, %s979_s14   ;;  %s741_s13 = sphi %s777_s13, %s978_s13   ;;  %s737_s12 = sphi %s775_s12, %s977_s12  }
   0x4   : > { %s46_s18 = ssub.s32 %s749_s15, %s797_s17  ;;  %s49_s19 = sadd.s32 1, %s745_s14 }
   0x5   : > { %p47_p0 = scmp.eq.s32.totalorder %s46_s18, 0  ;;  %p56_p1 = scmp.ne.s32.totalorder %s745_s14, %s741_s13 }
   0x6   : > { %p57_p2 = scmp.eq.s32.totalorder %s749_s15, 0  ;;  %p62_p3 = scmp.ne.s32.totalorder %s741_s13, %s737_s12 }
   0x7   : > { %s807_s20 = scalar_select %p47_p0, %s745_s14, %s49_s19  }
   0x8   : > { %p58_p4 = por %p57_p2, %p56_p1  ;;  %p63_p5 = scmp.eq.s32.totalorder %s794_s16, 0 }
   0x9   : > { %p645_p6 = scmp.lt.s32.totalorder %s749_s15, 4  ;;  %s139_s22 = sand.u32 1, %s745_s14  }
   0xa   : > { %p811_p7 = por %p63_p5, %p62_p3  ;;  %s494_s23 = sshll.u32 %s139_s22, 9 }
   0xb   : > { %s504_s24 = sshll.u32 %s749_s15, 13  ;;  %s143_s28 = scalar_lea.vmem [#allocation3], %s494_s23 }
   0xc   : > { %s820_s27 = scalar_lea.hbm %s971_s1, %s504_s24  ;;  %s150_s29 = sshll.u32 %s143_s28, 4  ;;  %s822_s29 = int_to_ptr.vmem [resolvable:$true] %s150_s29 }
   0xd   : > { %p824_p8 = pnand %p645_p6, %p58_p4  ;;  %s829_s4 = scalar_lea.sflag [#allocation4], %s139_s22 }
   0xe   : > { %s685_s5 = scalar_lea.hbm %s820_s27, 8192  ;;  %s690_s8 = scalar_lea.hbm %s971_s1, 32768 }
   0xf   : > { %p686_p10 = scmp.ne.s32.totalorder %s820_s27, %s685_s5  ;;  %p687_p11 = pneg %p824_p8 }
  0x10   : > { %p691_p0 = scmp.lt.u32.totalorder %s820_s27, %s971_s1  ;;  %p692_p1 = scmp.lt.u32.totalorder %s690_s8, %s685_s5 }
  0x11   : > { %p688_p12 = pnand %p687_p11, %p686_p10  ;;  %p694_p3 = scmp.lt.u32.totalorder %s685_s5, %s820_s27 }
  0x12   : > { %p693_p2 = por %p692_p1, %p691_p0 }
  0x13   : > { %p689_p13 = pneg %p688_p12 }
  0x14   : > { %p695_p4 = por %p694_p3, %p693_p2 }
  0x16   : > { %p696_p5 = pnand %p695_p4, %p689_p13 }
  0x18   : > { %699 = shalt.err (!%p696_p5)
}
  0x19   : > { %s700_s11 = scalar_lea.vmem %s822_s29, 8192  ;;  %s751_s12 = smov [#allocation3]  }
  0x1a   : > { %p701_p6 = scmp.ne.s32.totalorder %s822_s29, %s700_s11  ;;  %s705_s18 = sshll.u32 %s751_s12, 4  ;;  %s706_s18 = int_to_ptr.vmem [resolvable:$false] %s705_s18 }
  0x1b   : > { %s707_s19 = scalar_lea.vmem %s706_s18, 16384  ;;  %p708_p9 = scmp.lt.s32.totalorder %s822_s29, %s706_s18 }
  0x1c   : > { %p703_p10 = pnand %p701_p6, %p687_p11  ;;  %p709_p0 = scmp.lt.s32.totalorder %s707_s19, %s700_s11 }
  0x1e   : > { %p704_p12 = pneg %p703_p10  ;;  %p710_p1 = por %p709_p0, %p708_p9 }
  0x20   : > { %p711_p2 = pnand %p710_p1, %p704_p12 }
  0x22   : > { %714 = shalt.err (!%p711_p2)
}
  0x23   : > { %s752_s22 = smov 128   ;;  %s753_s23 = smov 8  }
  0x24   : > { %644 = dma.hbm_to_vmem [thread:$0]  (!%p824_p8), %s820_s27, 8192, %s822_s29, %s829_s4, %s752_s22, %s752_s22, %s753_s23  }
  0x25   : > { %p158_p11 = scmp.lt.s32.totalorder %s749_s15, 5  ;;  %p976_p13 = scmp.ge.s32.totalorder %s749_s15, 1 }
  0x27   : > { %p159_p3 = pnand %p976_p13, %p158_p11 }
  0x28   : > { %s164_s24 = sand.u32 (!%p159_p3), 1, %s741_s13  }
  0x29   : > { %162 = sbr.rel (%p159_p3) target bundleno = 353 (0x161), region = 32  ;;  %s498_s25 = sshll.u32 (!%p159_p3), %s164_s24, 9 }
  0x2a   : > { %s165_s26 = scalar_lea.sflag (!%p159_p3), [#allocation4], %s164_s24  ;;  %s861_s28 = scalar_lea.vmem (!%p159_p3), [#allocation3], %s498_s25 }
  0x30   : > { %732 = dma.done.wait (%p811_p7), %s165_s26, 8192  }
  0x31   : > { %734 = vsyncadd (%p811_p7), %s165_s26, 4294959104  ;;  %s499_s5 = sshll.u32 %s794_s16, 2  ;;  %p500_p8 = scmp.ne.s32.totalorder %s794_s16, 0 }
  0x32   : > { %p191_p9 = scmp.lt.s32.totalorder %s499_s5, 15  ;;  %v754_v0 = vmov (!%p500_p8), 0.0  }
  0x33   : > { %199 = sbr.rel (%p500_p8) target bundleno = 58 (0x3a), region = 40  ;;  %200 = vst [vmem:[#allocation2] sm:$0x1] (!%p500_p8), %v754_v0 }
  0x34   : > { %s982_s5 = smov (!%p191_p9, %s499_s5), 15 }
  0x35   : > { %s193_s29 = scalar_lea.vmem %s970_s0, %s982_s5 }
  0x3a PF: > { %v219_v1 = vld [vmem:[%s861_s28 + $0x80] sm:$0xff]  ;;  %v220_v2 = vld [vmem:[%s861_s28 + $0x88] sm:$0xff]  ;;  %v221_v12 = vld [vmem:[%s861_s28 + $0x90] sm:$0xff]  ;;  %v268_v48 = vlaneseq  ;;  %p501_p7 = scmp.ne.s32.totalorder %s794_s16, 3 }
  0x3b   : > { %v251_v3 = vld [vmem:[%s861_s28 + $0x180] sm:$0xff]  ;;  %v575_v4 = vpack.c.bf16 %v220_v2, %v219_v1  ;;  %v252_v5 = vld [vmem:[%s861_s28 + $0x188] sm:$0xff]  ;;  %v222_v14 = vld [vmem:[%s861_s28 + $0x98] sm:$0xff] }
  0x3c   : > { %v203_v6 = vld [vmem:[%s861_s28] sm:$0xff]  ;;  %v204_v7 = vld [vmem:[%s861_s28 + $0x8] sm:$0xff]  ;;  %v607_v8 = vpack.c.bf16 %v252_v5, %v251_v3  ;;  %v253_v15 = vld [vmem:[%s861_s28 + $0x190] sm:$0xff]  ;;  %v579_v17 = vpack.c.bf16 %v222_v14, %v221_v12  ;;  %v917_v62 = vshrl.u32 %v268_v48, 7 }
  0x3d   : > { %v577_v9 = vpack.c.bf16 %v204_v7, %v203_v6  ;;  %v235_v10 = vld [vmem:[%s861_s28 + $0x100] sm:$0xff]  ;;  %v236_v11 = vld [vmem:[%s861_s28 + $0x108] sm:$0xff]  ;;  %576 = vmatprep.subr.bf16.mxu0 %v575_v4  ;;  %v254_v16 = vld [vmem:[%s861_s28 + $0x198] sm:$0xff] }
  0x3e   : > { %v609_v13 = vpack.c.bf16 %v236_v11, %v235_v10  ;;  %608 = vmatprep.subr.bf16.mxu1 %v607_v8  ;;  %v611_v18 = vpack.c.bf16 %v254_v16, %v253_v15  ;;  %v205_v19 = vld [vmem:[%s861_s28 + $0x10] sm:$0xff]  ;;  %v206_v20 = vld [vmem:[%s861_s28 + $0x18] sm:$0xff]  ;;  %v223_v24 = vld [vmem:[%s861_s28 + $0xa0] sm:$0xff]  ;;  %v274_v11 = vsub.s32 1, %v917_v62  ;;  %v282_v12 = vsub.s32 3, %v917_v62 }
  0x3f   : > { %578 = vmatpush3.bf16.msra.mxu0 %v577_v9  ;;  %v237_v21 = vld [vmem:[%s861_s28 + $0x110] sm:$0xff]  ;;  %v581_v22 = vpack.c.bf16 %v206_v20, %v205_v19  ;;  %v238_v23 = vld [vmem:[%s861_s28 + $0x118] sm:$0xff]  ;;  %v224_v25 = vld [vmem:[%s861_s28 + $0xa8] sm:$0xff] }
  0x40   : > { %610 = vmatpush3.bf16.msra.mxu1 %v609_v13  ;;  %580 = vmatprep.subr.bf16.mxu0 %v579_v17  ;;  %v613_v26 = vpack.c.bf16 %v238_v23, %v237_v21  ;;  %v583_v27 = vpack.c.bf16 %v224_v25, %v223_v24  ;;  %v255_v28 = vld [vmem:[%s861_s28 + $0x1a0] sm:$0xff]  ;;  %v256_v29 = vld [vmem:[%s861_s28 + $0x1a8] sm:$0xff]  ;;  %v225_v36 = vld [vmem:[%s861_s28 + $0xb0] sm:$0xff] }
  0x41   : > { %612 = vmatprep.subr.bf16.mxu1 %v611_v18  ;;  %v207_v30 = vld [vmem:[%s861_s28 + $0x20] sm:$0xff]  ;;  %v615_v31 = vpack.c.bf16 %v256_v29, %v255_v28  ;;  %v208_v32 = vld [vmem:[%s861_s28 + $0x28] sm:$0xff]  ;;  %v226_v37 = vld [vmem:[%s861_s28 + $0xb8] sm:$0xff] }
  0x42   : > { %v239_v33 = vld [vmem:[%s861_s28 + $0x120] sm:$0xff]  ;;  %v240_v34 = vld [vmem:[%s861_s28 + $0x128] sm:$0xff]  ;;  %v585_v35 = vpack.c.bf16 %v208_v32, %v207_v30  ;;  %v257_v38 = vld [vmem:[%s861_s28 + $0x1b0] sm:$0xff]  ;;  %v587_v40 = vpack.c.bf16 %v226_v37, %v225_v36 }
  0x43   : > { %582 = vmatpush3.bf16.msra.mxu0 %v581_v22  ;;  %v617_v39 = vpack.c.bf16 %v240_v34, %v239_v33  ;;  %v258_v41 = vld [vmem:[%s861_s28 + $0x1b8] sm:$0xff]  ;;  %v209_v42 = vld [vmem:[%s861_s28 + $0x30] sm:$0xff]  ;;  %v227_v47 = vld [vmem:[%s861_s28 + $0xc0] sm:$0xff] }
  0x44   : > { %614 = vmatpush3.bf16.msra.mxu1 %v613_v26  ;;  %584 = vmatprep.subr.bf16.mxu0 %v583_v27  ;;  %v210_v43 = vld [vmem:[%s861_s28 + $0x38] sm:$0xff]  ;;  %v619_v44 = vpack.c.bf16 %v258_v41, %v257_v38  ;;  %v241_v45 = vld [vmem:[%s861_s28 + $0x130] sm:$0xff]  ;;  %v228_v49 = vld [vmem:[%s861_s28 + $0xc8] sm:$0xff]  ;;  %v270_v38 = vsub.s32 0, %v917_v62 }
  0x45   : > { %616 = vmatprep.subr.bf16.mxu1 %v615_v31  ;;  %v242_v46 = vld [vmem:[%s861_s28 + $0x138] sm:$0xff]  ;;  %v259_v50 = vld [vmem:[%s861_s28 + $0x1c0] sm:$0xff]  ;;  %v260_v51 = vld [vmem:[%s861_s28 + $0x1c8] sm:$0xff]  ;;  %v589_v52 = vpack.c.bf16 %v210_v43, %v209_v42  ;;  %v591_v54 = vpack.c.bf16 %v228_v49, %v227_v47 }
  0x46   : > { %v621_v53 = vpack.c.bf16 %v242_v46, %v241_v45  ;;  %v211_v55 = vld [vmem:[%s861_s28 + $0x40] sm:$0xff]  ;;  %v212_v56 = vld [vmem:[%s861_s28 + $0x48] sm:$0xff]  ;;  %v623_v58 = vpack.c.bf16 %v260_v51, %v259_v50  ;;  %v229_v60 = vld [vmem:[%s861_s28 + $0xd0] sm:$0xff] }
  0x47   : > { %586 = vmatpush3.bf16.msra.mxu0 %v585_v35  ;;  %v243_v57 = vld [vmem:[%s861_s28 + $0x140] sm:$0xff]  ;;  %v244_v59 = vld [vmem:[%s861_s28 + $0x148] sm:$0xff]  ;;  %v230_v61 = vld [vmem:[%s861_s28 + $0xd8] sm:$0xff]  ;;  %v593_v1 = vpack.c.bf16 %v212_v56, %v211_v55 }
  0x48   : > { %618 = vmatpush3.bf16.msra.mxu1 %v617_v39  ;;  %588 = vmatprep.subr.bf16.mxu0 %v587_v40  ;;  %v261_v63 = vld [vmem:[%s861_s28 + $0x1d0] sm:$0xff]  ;;  %v262_v0 = vld [vmem:[%s861_s28 + $0x1d8] sm:$0xff]  ;;  %v625_v2 = vpack.c.bf16 %v244_v59, %v243_v57  ;;  %v595_v3 = vpack.c.bf16 %v230_v61, %v229_v60  ;;  %v231_v9 = vld [vmem:[%s861_s28 + $0xe0] sm:$0xff]  ;;  %v278_v40 = vsub.s32 2, %v917_v62 }
  0x49   : > { %620 = vmatprep.subr.bf16.mxu1 %v619_v44  ;;  %v213_v4 = vld [vmem:[%s861_s28 + $0x50] sm:$0xff]  ;;  %v214_v5 = vld [vmem:[%s861_s28 + $0x58] sm:$0xff]  ;;  %v627_v7 = vpack.c.bf16 %v262_v0, %v261_v63  ;;  %v232_v10 = vld [vmem:[%s861_s28 + $0xe8] sm:$0xff] }
  0x4a   : > { %v245_v6 = vld [vmem:[%s861_s28 + $0x150] sm:$0xff]  ;;  %v246_v8 = vld [vmem:[%s861_s28 + $0x158] sm:$0xff]  ;;  %v263_v13 = vld [vmem:[%s861_s28 + $0x1e0] sm:$0xff]  ;;  %v597_v15 = vpack.c.bf16 %v214_v5, %v213_v4  ;;  %v599_v18 = vpack.c.bf16 %v232_v10, %v231_v9 }
  0x4b   : > { %590 = vmatpush3.bf16.msra.mxu0 %v589_v52  ;;  %v264_v14 = vld [vmem:[%s861_s28 + $0x1e8] sm:$0xff]  ;;  %v215_v16 = vld [vmem:[%s861_s28 + $0x60] sm:$0xff]  ;;  %v629_v17 = vpack.c.bf16 %v246_v8, %v245_v6  ;;  %v233_v24 = vld [vmem:[%s861_s28 + $0xf0] sm:$0xff] }
  0x4c   : > { %622 = vmatpush3.bf16.msra.mxu1 %v621_v53  ;;  %592 = vmatprep.subr.bf16.mxu0 %v591_v54  ;;  %v216_v19 = vld [vmem:[%s861_s28 + $0x68] sm:$0xff]  ;;  %v247_v20 = vld [vmem:[%s861_s28 + $0x160] sm:$0xff]  ;;  %v631_v22 = vpack.c.bf16 %v264_v14, %v263_v13  ;;  %v234_v25 = vld [vmem:[%s861_s28 + $0xf8] sm:$0xff] }
  0x4d   : > { %624 = vmatprep.subr.bf16.mxu1 %v623_v58  ;;  %v202_v21 = vld [vmem:[%s193_s29] sm:$0xf]  ;;  %v248_v23 = vld [vmem:[%s861_s28 + $0x168] sm:$0xff]  ;;  %v265_v28 = vld [vmem:[%s861_s28 + $0x1f0] sm:$0xff]  ;;  %v601_v30 = vpack.c.bf16 %v216_v19, %v215_v16  ;;  %v603_v32 = vpack.c.bf16 %v234_v25, %v233_v24 }
  0x4e   : > { %v275_v26 = vrot.slane %v202_v21, %v274_v11  ;;  %v283_v27 = vrot.slane %v202_v21, %v282_v12  ;;  %v266_v29 = vld [vmem:[%s861_s28 + $0x1f8] sm:$0xff]  ;;  %v633_v31 = vpack.c.bf16 %v248_v23, %v247_v20  ;;  %v217_v33 = vld [vmem:[%s861_s28 + $0x70] sm:$0xff]  ;;  %v271_v42 = vrot.slane %v202_v21, %v270_v38 }
  0x4f   : > { %594 = vmatpush3.bf16.msra.mxu0 %v593_v1  ;;  %v218_v34 = vld [vmem:[%s861_s28 + $0x78] sm:$0xff]  ;;  %v635_v35 = vpack.c.bf16 %v266_v29, %v265_v28  ;;  %v249_v36 = vld [vmem:[%s861_s28 + $0x170] sm:$0xff]  ;;  %v279_v43 = vrot.slane %v202_v21, %v278_v40 }
  0x50   : > { %626 = vmatpush3.bf16.msra.mxu1 %v625_v2  ;;  %596 = vmatprep.subr.bf16.mxu0 %v595_v3  ;;  %v250_v37 = vld [vmem:[%s861_s28 + $0x178] sm:$0xff]  ;;  %v605_v39 = vpack.c.bf16 %v218_v34, %v217_v33 }
  0x51   : > { %628 = vmatprep.subr.bf16.mxu1 %v627_v7  ;;  %352 = vmatprep.mubr.f32.mxu0 %v275_v26  ;;  %v637_v41 = vpack.c.bf16 %v250_v37, %v249_v36  ;;  %v201_v50 = vld [vmem:[#allocation2] sm:$0x1] }
  0x52   : > { %422 = vmatprep.mubr.f32.mxu1 %v283_v27  ;;  %v435_v54 = vld [vmem:[%s972_s2] sm:$0x1] (!%p501_p7) }
  0x53   : > { %598 = vmatpush3.bf16.msra.mxu0 %v597_v15 }
  0x54   : > { %630 = vmatpush3.bf16.msra.mxu1 %v629_v17  ;;  %600 = vmatprep.subr.bf16.mxu0 %v599_v18 }
  0x55   : > { %632 = vmatprep.subr.bf16.mxu1 %v631_v22 }
  0x57   : > { %602 = vmatpush3.bf16.msra.mxu0 %v601_v30 }
  0x58   : > { %634 = vmatpush3.bf16.msra.mxu1 %v633_v31  ;;  %604 = vmatprep.subr.bf16.mxu0 %v603_v32 }
  0x59   : > { %636 = vmatprep.subr.bf16.mxu1 %v635_v35 }
  0x5b   : > { %606 = vmatpush3.bf16.msra.mxu0 %v605_v39 }
  0x5c   : > { %638 = vmatpush3.bf16.msra.mxu1 %v637_v41 }
  0x5e   : > { %353 = vmatmul.mubr.f32.vlgmr.msra.gmra.mrb[0].mxu0 %v271_v42 }
  0x5f   : > { %423 = vmatmul.mubr.f32.vlgmr.msra.gmra.mrb[0].mxu1 %v279_v43 }
 0x131   : > { %v537_v44 = vpop.f32.mrb[0].mxu0 }
 0x132   : > { %v572_v45 = vpop.f32.mrb[0].mxu1  ;;  %v538_v46 = vpop.f32.mrb[1].mxu0 }
 0x133   : > { %v539_v47 = vadd.f32 %v538_v46, %v537_v44  ;;  %v573_v48 = vpop.f32.mrb[1].mxu1 }
 0x134   : > { %v574_v49 = vadd.f32 %v573_v48, %v572_v45  ;;  %433 = sbr.rel (%p501_p7) target bundleno = 353 (0x161), region = 44 }
 0x136   : > { %v425_v51 = vadd.f32 %v574_v49, %v539_v47 }
 0x138   : > { %v428_v52 = vadd.f32 %v425_v51, %v201_v50 }
 0x13a   : > { %429 = vst [vmem:[#allocation2] sm:$0x1] %v428_v52 }
 0x141   : > { %v434_v53 = vld [vmem:[#allocation2] sm:$0x1] }
 0x142   : > { %v436_v55 = vadd.f32 %v435_v54, %v434_v53 }
 0x144   : > { %v437_v56 = vsub.f32 0.0, %v436_v55 }
 0x146   : > { %v438_v57 = vmul.f32 1.442695, %v437_v56 }
 0x148   : > { %681 = vpow2.f32 %v438_v57 }
 0x152   : > { %v682_v58 = vpop.eup %681 }
 0x153   : > { %v440_v59 = vadd.f32 1.0, %v682_v58 }
 0x155   : > { %683 = vrcp.f32 %v440_v59 }
 0x15f   : > { %v684_v60 = vpop.eup %683 }
 0x160   : > { %442 = vst [vmem:[%s973_s3] sm:$0x1] %v684_v60 }
 0x161 PF: > { %p13_p4 = scmp.ge.s32.totalorder %s797_s17, 6   ;;  %s977_s12 = smov %s741_s13 }
 0x162   : > { %s978_s13 = smov %s745_s14  ;;  %s979_s14 = smov %s807_s20 }
 0x163   : > { %s980_s15 = smov %s797_s17  ;;  %15 = sbr.rel (!%p13_p4) target bundleno = 3 (0x3), region = 79 }
 0x16a   :  { %454 = vsyncpa [#allocation4], 1 }
 0x16b   :  { %456 = vsyncpa [#allocation4 + $0x1], 1 }

</bundles_post_ra>
